<compile_context>
chip_gen: v5e
topology: v5e:2x2
jax: 0.10.0
libtpu: 0.0.40
codegen_flags: <defaults>
</compile_context>

<pallas_src>
import functools

import jax
import jax.numpy as jnp
from jax.experimental import pallas as pl
from jax.experimental.pallas import tpu as pltpu

BN_EPS = 1e-5
LANE = 128
SUBLANE = 8


def _round_up(x, m):
    return (x + m - 1) // m * m


# ----------------------------- pass 1: BN batch statistics -----------------------------
def bn_stats_kernel(x_ref, mask_ref, w1_ref, b1_ref, sum_ref, sumsq_ref):
    @pl.when(pl.program_id(0) == 0)
    def _():
        sum_ref[...] = jnp.zeros_like(sum_ref)
        sumsq_ref[...] = jnp.zeros_like(sumsq_ref)

    h = jnp.dot(x_ref[...], w1_ref[...], preferred_element_type=jnp.float32)
    h = (h + b1_ref[...]) * mask_ref[...]          # zero-out padded batch rows
    sum_ref[...] += jnp.sum(h, axis=0, keepdims=True)
    sumsq_ref[...] += jnp.sum(h * h, axis=0, keepdims=True)


# ----------------------------- pass 2: fused forward -----------------------------------
def fnn_kernel(x_ref, w1_ref, b1_ref, scale_ref, shift_ref,
               w2_ref, b2_ref, w3_ref, b3_ref, out_ref):
    # Linear(in -> hidden); BN folded into a precomputed per-feature affine (f32).
    h = jnp.dot(x_ref[...], w1_ref[...], preferred_element_type=jnp.float32) + b1_ref[...]
    h = jnp.maximum(h * scale_ref[...] + shift_ref[...], 0.0)
    # Linear(hidden -> out_features)  (MLP output, no activation inside MLP)
    y = jnp.dot(h.astype(w2_ref.dtype), w2_ref[...],
                preferred_element_type=jnp.float32) + b2_ref[...]
    # FNN: linear2(ReLU(MLP(x)))
    y = jnp.maximum(y, 0.0)
    out = jnp.dot(y.astype(w3_ref.dtype), w3_ref[...],
                  preferred_element_type=jnp.float32) + b3_ref[...]
    out_ref[...] = out                              # already f32, lane-dense store


# ----------------------------- wrapper ---------------------------------------------------
@functools.partial(jax.jit, static_argnames=("tile_n", "use_bf16_matmul"))
def fnn_forward(x, params, *, tile_n=256, use_bf16_matmul=False):
    w1, b1, gamma, beta, w2, b2, w3, b3 = params
    n, in_f = x.shape
    hid = w1.shape[1]
    out_f = w3.shape[1]
    mm_dtype = jnp.bfloat16 if use_bf16_matmul else jnp.float32

    # ---- lane / sublane padding (zero-pad; numerically inert: padded hidden cols have
    #      gamma=0 -> scale=0 -> ReLU(0)=0; padded W2/W3 rows/cols are 0) ----
    in_p = _round_up(in_f, LANE)
    hid_p = _round_up(hid, LANE)
    out_p = _round_up(out_f, LANE)
    tile_n = _round_up(min(tile_n, _round_up(n, SUBLANE)), SUBLANE)
    n_pad = _round_up(n, tile_n)
    grid = (n_pad // tile_n,)

    def pad2(a, r, c):
        return jnp.pad(a, ((0, r - a.shape[0]), (0, c - a.shape[1])))

    x_p = pad2(x, n_pad, in_p).astype(mm_dtype)
    w1_p = pad2(w1, in_p, hid_p).astype(mm_dtype)
    b1_p = pad2(b1, 1, hid_p)
    g_p = pad2(gamma, 1, hid_p)
    be_p = pad2(beta, 1, hid_p)
    w2_p = pad2(w2, hid_p, out_p).astype(mm_dtype)
    b2_p = pad2(b2, 1, out_p)
    w3_p = pad2(w3, out_p, out_p).astype(mm_dtype)
    b3_p = pad2(b3, 1, out_p)
    row_mask = (jnp.arange(n_pad, dtype=jnp.int32) < n).astype(jnp.float32)[:, None]

    resident = lambda shape: pl.BlockSpec(shape, lambda i: (0, 0))   # VMEM-resident
    x_spec = pl.BlockSpec((tile_n, in_p), lambda i: (i, 0))
    mask_spec = pl.BlockSpec((tile_n, 1), lambda i: (i, 0))

    # Rough VMEM budget: resident weights + double-buffered streams + live intermediates,
    # 2x headroom, clamped to the smallest per-chip scoped limit (v7x: 32 MiB of 64 MiB).
    isz = 2 if use_bf16_matmul else 4
    resident_b = (in_p * hid_p + hid_p * out_p + out_p * out_p) * isz + (3 * hid_p + 2 * out_p) * 4
    stream_b = 2 * tile_n * (in_p * isz + out_p * 4 + 4)
    live_b = 2 * tile_n * (hid_p + out_p) * 4
    vmem_limit = min(2 * (resident_b + stream_b + live_b) + (4 << 20), 32 << 20)

    # ---- pass 1: full-batch BN statistics (reduction over batch tiles) ----
    h_sum, h_sumsq = pl.pallas_call(
        bn_stats_kernel,
        grid=grid,
        in_specs=[x_spec, mask_spec, resident((in_p, hid_p)), resident((1, hid_p))],
        out_specs=[resident((1, hid_p)), resident((1, hid_p))],
        out_shape=[jax.ShapeDtypeStruct((1, hid_p), jnp.float32),
                   jax.ShapeDtypeStruct((1, hid_p), jnp.float32)],
        compiler_params=pltpu.CompilerParams(
            dimension_semantics=("arbitrary",),          # accumulator output block
            vmem_limit_bytes=vmem_limit),
    )(x_p, row_mask, w1_p, b1_p)

    mean = h_sum / n
    var = jnp.maximum(h_sumsq / n - mean * mean, 0.0)    # biased variance (BN train mode)
    scale = g_p * jax.lax.rsqrt(var + BN_EPS)
    shift = be_p - mean * scale

    # ---- pass 2: fused Linear -> BN affine -> ReLU -> Linear -> ReLU -> Linear ----
    out_padded = pl.pallas_call(
        fnn_kernel,
        grid=grid,
        in_specs=[x_spec,
                  resident((in_p, hid_p)), resident((1, hid_p)),
                  resident((1, hid_p)), resident((1, hid_p)),
                  resident((hid_p, out_p)), resident((1, out_p)),
                  resident((out_p, out_p)), resident((1, out_p))],
        out_specs=pl.BlockSpec((tile_n, out_p), lambda i: (i, 0)),
        out_shape=jax.ShapeDtypeStruct((n_pad, out_p), jnp.float32),
        compiler_params=pltpu.CompilerParams(
            dimension_semantics=("parallel",),           # shards batch tiles across TCs (v7x)
            vmem_limit_bytes=vmem_limit),
    )(x_p, w1_p, b1_p, scale, shift, w2_p, b2_p, w3_p, b3_p)

    return out_padded[:n, :out_f]


# ----------------------------- pure-JAX reference / init --------------------------------
def fnn_reference(x, params):
    w1, b1, gamma, beta, w2, b2, w3, b3 = params
    h = x @ w1 + b1
    mu = h.mean(axis=0, keepdims=True)
    var = ((h - mu) ** 2).mean(axis=0, keepdims=True)
    h = (h - mu) * jax.lax.rsqrt(var + BN_EPS) * gamma + beta
    h = jnp.maximum(h, 0.0)
    y = jnp.maximum(h @ w2 + b2, 0.0)
    return y @ w3 + b3


def init_params(key, in_features, hidden, out_features):
    ks = jax.random.split(key, 3)

    def lin(k, fan_in, fan_out):
        kw, kb = jax.random.split(k)
        bound = 1.0 / jnp.sqrt(fan_in)
        w = jax.random.uniform(kw, (fan_in, fan_out), jnp.float32, -bound, bound)
        b = jax.random.uniform(kb, (1, fan_out), jnp.float32, -bound, bound)
        return w, b

    w1, b1 = lin(ks[0], in_features, hidden)            # MLP.linears[0]
    gamma = jnp.ones((1, hidden), jnp.float32)          # BatchNorm1d weight
    beta = jnp.zeros((1, hidden), jnp.float32)          # BatchNorm1d bias
    w2, b2 = lin(ks[1], hidden, out_features)           # MLP.linears[1]
    w3, b3 = lin(ks[2], out_features, out_features)     # FNN.linear2
    return (w1, b1, gamma, beta, w2, b2, w3, b3)


if __name__ == "__main__":
    # FNN(in_features=16, hidden=32, out_features=8, layer_num=2); N=40 with tile_n=16
    # exercises 3 batch tiles (last one padded + masked out of the BN statistics).
    N, IN_F, HID, OUT_F = 40, 16, 32, 8

    key = jax.random.PRNGKey(0)
    k_x, k_p = jax.random.split(key)
    x = jax.random.normal(k_x, (N, IN_F), jnp.float32)
    params = init_params(k_p, IN_F, HID, OUT_F)

    ref = fnn_reference(x, params)

    out = jax.block_until_ready(fnn_forward(x, params, tile_n=16))
    assert out.shape == (N, OUT_F)
    assert jnp.allclose(out, ref, rtol=1e-4, atol=1e-4), float(jnp.max(jnp.abs(out - ref)))

    # bf16 matmul operands (v6e/v7x MXU path); BN statistics / affine stay in f32.
    out_bf16 = jax.block_until_ready(fnn_forward(x, params, tile_n=16, use_bf16_matmul=True))
    assert out_bf16.shape == (N, OUT_F)
    assert float(jnp.max(jnp.abs(out_bf16 - ref))) < 0.25

    print("KERNEL_OK")
</pallas_src>

<mosaic_0001>
module attributes {stable_mosaic.version = 11 : i64} {
  func.func @fnn_kernel(%arg0: i32, %arg1: memref<16x128xf32, #tpu.memory_space<vmem>>, %arg2: memref<128x128xf32, #tpu.memory_space<vmem>>, %arg3: memref<1x128xf32, #tpu.memory_space<vmem>>, %arg4: memref<1x128xf32, #tpu.memory_space<vmem>>, %arg5: memref<1x128xf32, #tpu.memory_space<vmem>>, %arg6: memref<128x128xf32, #tpu.memory_space<vmem>>, %arg7: memref<1x128xf32, #tpu.memory_space<vmem>>, %arg8: memref<128x128xf32, #tpu.memory_space<vmem>>, %arg9: memref<1x128xf32, #tpu.memory_space<vmem>>, %arg10: memref<16x128xf32, #tpu.memory_space<vmem>>) attributes {dimension_semantics = [#tpu.dimension_semantics<parallel>], iteration_bounds = array<i64: 3>, scalar_prefetch = 0 : i64, scratch_operands = 0 : i64, tpu.core_type = #tpu.core_type<tc>, window_params = [{transform_indices = @transform_0, window_bounds = array<i64: 16, 128>}, {pipeline_mode = #tpu.pipeline_mode<synchronous>, transform_indices = @transform_1, window_bounds = array<i64: 128, 128>}, {pipeline_mode = #tpu.pipeline_mode<synchronous>, transform_indices = @transform_2, window_bounds = array<i64: 1, 128>}, {pipeline_mode = #tpu.pipeline_mode<synchronous>, transform_indices = @transform_3, window_bounds = array<i64: 1, 128>}, {pipeline_mode = #tpu.pipeline_mode<synchronous>, transform_indices = @transform_4, window_bounds = array<i64: 1, 128>}, {pipeline_mode = #tpu.pipeline_mode<synchronous>, transform_indices = @transform_5, window_bounds = array<i64: 128, 128>}, {pipeline_mode = #tpu.pipeline_mode<synchronous>, transform_indices = @transform_6, window_bounds = array<i64: 1, 128>}, {pipeline_mode = #tpu.pipeline_mode<synchronous>, transform_indices = @transform_7, window_bounds = array<i64: 128, 128>}, {pipeline_mode = #tpu.pipeline_mode<synchronous>, transform_indices = @transform_8, window_bounds = array<i64: 1, 128>}, {transform_indices = @transform_9, window_bounds = array<i64: 16, 128>}]} {
    %c0 = arith.constant 0 : index
    %c0_0 = arith.constant 0 : index
    %0 = vector.load %arg1[%c0, %c0_0] : memref<16x128xf32, #tpu.memory_space<vmem>>, vector<16x128xf32>
    %c0_1 = arith.constant 0 : index
    %c0_2 = arith.constant 0 : index
    %1 = vector.load %arg2[%c0_1, %c0_2] : memref<128x128xf32, #tpu.memory_space<vmem>>, vector<128x128xf32>
    %cst = arith.constant dense<0.000000e+00> : vector<16x128xf32>
    %2 = tpu.matmul %0, %1, %cst {dimension_numbers = #tpu.dot_dimension_numbers<[1], [0], [0], [1], [0, 0, 1, 1], [], []>} : vector<16x128xf32>, vector<128x128xf32>, vector<16x128xf32> -> vector<16x128xf32>
    %c0_3 = arith.constant 0 : index
    %c0_4 = arith.constant 0 : index
    %3 = vector.load %arg3[%c0_3, %c0_4] : memref<1x128xf32, #tpu.memory_space<vmem>>, vector<1x128xf32>
    %4 = vector.broadcast %3 : vector<1x128xf32> to vector<16x128xf32>
    %5 = arith.addf %2, %4 : vector<16x128xf32>
    %c0_5 = arith.constant 0 : index
    %c0_6 = arith.constant 0 : index
    %6 = vector.load %arg4[%c0_5, %c0_6] : memref<1x128xf32, #tpu.memory_space<vmem>>, vector<1x128xf32>
    %7 = vector.broadcast %6 : vector<1x128xf32> to vector<16x128xf32>
    %8 = arith.mulf %5, %7 : vector<16x128xf32>
    %c0_7 = arith.constant 0 : index
    %c0_8 = arith.constant 0 : index
    %9 = vector.load %arg5[%c0_7, %c0_8] : memref<1x128xf32, #tpu.memory_space<vmem>>, vector<1x128xf32>
    %10 = vector.broadcast %9 : vector<1x128xf32> to vector<16x128xf32>
    %11 = arith.addf %8, %10 : vector<16x128xf32>
    %cst_9 = arith.constant 0.000000e+00 : f32
    %12 = vector.broadcast %cst_9 : f32 to vector<16x128xf32>
    %13 = arith.maximumf %11, %12 : vector<16x128xf32>
    %c0_10 = arith.constant 0 : index
    %c0_11 = arith.constant 0 : index
    %14 = vector.load %arg6[%c0_10, %c0_11] : memref<128x128xf32, #tpu.memory_space<vmem>>, vector<128x128xf32>
    %cst_12 = arith.constant dense<0.000000e+00> : vector<16x128xf32>
    %15 = tpu.matmul %13, %14, %cst_12 {dimension_numbers = #tpu.dot_dimension_numbers<[1], [0], [0], [1], [0, 0, 1, 1], [], []>} : vector<16x128xf32>, vector<128x128xf32>, vector<16x128xf32> -> vector<16x128xf32>
    %c0_13 = arith.constant 0 : index
    %c0_14 = arith.constant 0 : index
    %16 = vector.load %arg7[%c0_13, %c0_14] : memref<1x128xf32, #tpu.memory_space<vmem>>, vector<1x128xf32>
    %17 = vector.broadcast %16 : vector<1x128xf32> to vector<16x128xf32>
    %18 = arith.addf %15, %17 : vector<16x128xf32>
    %cst_15 = arith.constant 0.000000e+00 : f32
    %19 = vector.broadcast %cst_15 : f32 to vector<16x128xf32>
    %20 = arith.maximumf %18, %19 : vector<16x128xf32>
    %c0_16 = arith.constant 0 : index
    %c0_17 = arith.constant 0 : index
    %21 = vector.load %arg8[%c0_16, %c0_17] : memref<128x128xf32, #tpu.memory_space<vmem>>, vector<128x128xf32>
    %cst_18 = arith.constant dense<0.000000e+00> : vector<16x128xf32>
    %22 = tpu.matmul %20, %21, %cst_18 {dimension_numbers = #tpu.dot_dimension_numbers<[1], [0], [0], [1], [0, 0, 1, 1], [], []>} : vector<16x128xf32>, vector<128x128xf32>, vector<16x128xf32> -> vector<16x128xf32>
    %c0_19 = arith.constant 0 : index
    %c0_20 = arith.constant 0 : index
    %23 = vector.load %arg9[%c0_19, %c0_20] : memref<1x128xf32, #tpu.memory_space<vmem>>, vector<1x128xf32>
    %24 = vector.broadcast %23 : vector<1x128xf32> to vector<16x128xf32>
    %25 = arith.addf %22, %24 : vector<16x128xf32>
    %c0_21 = arith.constant 0 : index
    %c0_22 = arith.constant 0 : index
    %26 = vector.load %arg10[%c0_21, %c0_22] : memref<16x128xf32, #tpu.memory_space<vmem>>, vector<16x128xf32>
    tpu.vector_store %arg10[%c0_21, %c0_22], %25 {strides = array<i32>} : memref<16x128xf32, #tpu.memory_space<vmem>>, vector<16x128xf32>,
    return
  }
  func.func @transform_0(%arg0: i32) -> (i32, i32) {
    %c0_i32 = arith.constant 0 : i32
    %c0_i32_0 = arith.constant 0 : i32
    return %arg0, %c0_i32 : i32, i32
  }
  func.func @transform_1(%arg0: i32) -> (i32, i32) {
    %c0_i32 = arith.constant 0 : i32
    %c0_i32_0 = arith.constant 0 : i32
    %c0_i32_1 = arith.constant 0 : i32
    return %c0_i32, %c0_i32_0 : i32, i32
  }
  func.func @transform_2(%arg0: i32) -> (i32, i32) {
    %c0_i32 = arith.constant 0 : i32
    %c0_i32_0 = arith.constant 0 : i32
    %c0_i32_1 = arith.constant 0 : i32
    return %c0_i32, %c0_i32_0 : i32, i32
  }
  func.func @transform_3(%arg0: i32) -> (i32, i32) {
    %c0_i32 = arith.constant 0 : i32
    %c0_i32_0 = arith.constant 0 : i32
    %c0_i32_1 = arith.constant 0 : i32
    return %c0_i32, %c0_i32_0 : i32, i32
  }
  func.func @transform_4(%arg0: i32) -> (i32, i32) {
    %c0_i32 = arith.constant 0 : i32
    %c0_i32_0 = arith.constant 0 : i32
    %c0_i32_1 = arith.constant 0 : i32
    return %c0_i32, %c0_i32_0 : i32, i32
  }
  func.func @transform_5(%arg0: i32) -> (i32, i32) {
    %c0_i32 = arith.constant 0 : i32
    %c0_i32_0 = arith.constant 0 : i32
    %c0_i32_1 = arith.constant 0 : i32
    return %c0_i32, %c0_i32_0 : i32, i32
  }
  func.func @transform_6(%arg0: i32) -> (i32, i32) {
    %c0_i32 = arith.constant 0 : i32
    %c0_i32_0 = arith.constant 0 : i32
    %c0_i32_1 = arith.constant 0 : i32
    return %c0_i32, %c0_i32_0 : i32, i32
  }
  func.func @transform_7(%arg0: i32) -> (i32, i32) {
    %c0_i32 = arith.constant 0 : i32
    %c0_i32_0 = arith.constant 0 : i32
    %c0_i32_1 = arith.constant 0 : i32
    return %c0_i32, %c0_i32_0 : i32, i32
  }
  func.func @transform_8(%arg0: i32) -> (i32, i32) {
    %c0_i32 = arith.constant 0 : i32
    %c0_i32_0 = arith.constant 0 : i32
    %c0_i32_1 = arith.constant 0 : i32
    return %c0_i32, %c0_i32_0 : i32, i32
  }
  func.func @transform_9(%arg0: i32) -> (i32, i32) {
    %c0_i32 = arith.constant 0 : i32
    %c0_i32_0 = arith.constant 0 : i32
    return %arg0, %c0_i32 : i32, i32
  }
}

module attributes {stable_mosaic.version = 11 : i64} {
  func.func @bn_stats_kernel(%arg0: i32, %arg1: memref<16x128xf32, #tpu.memory_space<vmem>>, %arg2: memref<16x1xf32, #tpu.memory_space<vmem>>, %arg3: memref<128x128xf32, #tpu.memory_space<vmem>>, %arg4: memref<1x128xf32, #tpu.memory_space<vmem>>, %arg5: memref<1x128xf32, #tpu.memory_space<vmem>>, %arg6: memref<1x128xf32, #tpu.memory_space<vmem>>) attributes {dimension_semantics = [#tpu.dimension_semantics<arbitrary>], iteration_bounds = array<i64: 3>, scalar_prefetch = 0 : i64, scratch_operands = 0 : i64, tpu.core_type = #tpu.core_type<tc>, window_params = [{transform_indices = @transform_0, window_bounds = array<i64: 16, 128>}, {transform_indices = @transform_1, window_bounds = array<i64: 16, 1>}, {pipeline_mode = #tpu.pipeline_mode<synchronous>, transform_indices = @transform_2, window_bounds = array<i64: 128, 128>}, {pipeline_mode = #tpu.pipeline_mode<synchronous>, transform_indices = @transform_3, window_bounds = array<i64: 1, 128>}, {pipeline_mode = #tpu.pipeline_mode<synchronous>, transform_indices = @transform_4, window_bounds = array<i64: 1, 128>}, {pipeline_mode = #tpu.pipeline_mode<synchronous>, transform_indices = @transform_5, window_bounds = array<i64: 1, 128>}]} {
    %c0_i32 = arith.constant 0 : i32
    %0 = arith.cmpi eq, %arg0, %c0_i32 : i32
    %1 = arith.extui %0 : i1 to i32
    %c0_i32_0 = arith.constant 0 : i32
    %2 = arith.cmpi ne, %1, %c0_i32_0 : i32
    scf.if %2 {
      %cst_18 = arith.constant 0.000000e+00 : f32
      %23 = vector.broadcast %cst_18 : f32 to vector<1x128xf32>
      %c0_19 = arith.constant 0 : index
      %c0_20 = arith.constant 0 : index
      %24 = vector.load %arg5[%c0_19, %c0_20] : memref<1x128xf32, #tpu.memory_space<vmem>>, vector<1x128xf32>
      tpu.vector_store %arg5[%c0_19, %c0_20], %23 {strides = array<i32>} : memref<1x128xf32, #tpu.memory_space<vmem>>, vector<1x128xf32>,
      %cst_21 = arith.constant 0.000000e+00 : f32
      %25 = vector.broadcast %cst_21 : f32 to vector<1x128xf32>
      %c0_22 = arith.constant 0 : index
      %c0_23 = arith.constant 0 : index
      %26 = vector.load %arg6[%c0_22, %c0_23] : memref<1x128xf32, #tpu.memory_space<vmem>>, vector<1x128xf32>
      tpu.vector_store %arg6[%c0_22, %c0_23], %25 {strides = array<i32>} : memref<1x128xf32, #tpu.memory_space<vmem>>, vector<1x128xf32>,
    } else {
    }
    %c0 = arith.constant 0 : index
    %c0_1 = arith.constant 0 : index
    %3 = vector.load %arg1[%c0, %c0_1] : memref<16x128xf32, #tpu.memory_space<vmem>>, vector<16x128xf32>
    %c0_2 = arith.constant 0 : index
    %c0_3 = arith.constant 0 : index
    %4 = vector.load %arg3[%c0_2, %c0_3] : memref<128x128xf32, #tpu.memory_space<vmem>>, vector<128x128xf32>
    %cst = arith.constant dense<0.000000e+00> : vector<16x128xf32>
    %5 = tpu.matmul %3, %4, %cst {dimension_numbers = #tpu.dot_dimension_numbers<[1], [0], [0], [1], [0, 0, 1, 1], [], []>} : vector<16x128xf32>, vector<128x128xf32>, vector<16x128xf32> -> vector<16x128xf32>
    %c0_4 = arith.constant 0 : index
    %c0_5 = arith.constant 0 : index
    %6 = vector.load %arg4[%c0_4, %c0_5] : memref<1x128xf32, #tpu.memory_space<vmem>>, vector<1x128xf32>
    %7 = vector.broadcast %6 : vector<1x128xf32> to vector<16x128xf32>
    %8 = arith.addf %5, %7 : vector<16x128xf32>
    %c0_6 = arith.constant 0 : index
    %c0_7 = arith.constant 0 : index
    %9 = vector.load %arg2[%c0_6, %c0_7] : memref<16x1xf32, #tpu.memory_space<vmem>>, vector<16x1xf32>
    %10 = vector.broadcast %9 : vector<16x1xf32> to vector<16x128xf32>
    %11 = arith.mulf %8, %10 : vector<16x128xf32>
    %c0_8 = arith.constant 0 : index
    %c0_9 = arith.constant 0 : index
    %12 = vector.load %arg5[%c0_8, %c0_9] : memref<1x128xf32, #tpu.memory_space<vmem>>, vector<1x128xf32>
    %cst_10 = arith.constant dense<0.000000e+00> : vector<128xf32>
    %13 = vector.multi_reduction <add>, %11, %cst_10 [0] : vector<16x128xf32> to vector<128xf32>
    %14 = vector.shape_cast %13 : vector<128xf32> to vector<1x128xf32>
    %15 = arith.addf %12, %14 : vector<1x128xf32>
    %c0_11 = arith.constant 0 : index
    %c0_12 = arith.constant 0 : index
    %16 = vector.load %arg5[%c0_11, %c0_12] : memref<1x128xf32, #tpu.memory_space<vmem>>, vector<1x128xf32>
    tpu.vector_store %arg5[%c0_11, %c0_12], %15 {strides = array<i32>} : memref<1x128xf32, #tpu.memory_space<vmem>>, vector<1x128xf32>,
    %c0_13 = arith.constant 0 : index
    %c0_14 = arith.constant 0 : index
    %17 = vector.load %arg6[%c0_13, %c0_14] : memref<1x128xf32, #tpu.memory_space<vmem>>, vector<1x128xf32>
    %18 = arith.mulf %11, %11 : vector<16x128xf32>
    %cst_15 = arith.constant dense<0.000000e+00> : vector<128xf32>
    %19 = vector.multi_reduction <add>, %18, %cst_15 [0] : vector<16x128xf32> to vector<128xf32>
    %20 = vector.shape_cast %19 : vector<128xf32> to vector<1x128xf32>
    %21 = arith.addf %17, %20 : vector<1x128xf32>
    %c0_16 = arith.constant 0 : index
    %c0_17 = arith.constant 0 : index
    %22 = vector.load %arg6[%c0_16, %c0_17] : memref<1x128xf32, #tpu.memory_space<vmem>>, vector<1x128xf32>
    tpu.vector_store %arg6[%c0_16, %c0_17], %21 {strides = array<i32>} : memref<1x128xf32, #tpu.memory_space<vmem>>, vector<1x128xf32>,
    return
  }
  func.func @transform_0(%arg0: i32) -> (i32, i32) {
    %c0_i32 = arith.constant 0 : i32
    %c0_i32_0 = arith.constant 0 : i32
    return %arg0, %c0_i32 : i32, i32
  }
  func.func @transform_1(%arg0: i32) -> (i32, i32) {
    %c0_i32 = arith.constant 0 : i32
    %c0_i32_0 = arith.constant 0 : i32
    return %arg0, %c0_i32 : i32, i32
  }
  func.func @transform_2(%arg0: i32) -> (i32, i32) {
    %c0_i32 = arith.constant 0 : i32
    %c0_i32_0 = arith.constant 0 : i32
    %c0_i32_1 = arith.constant 0 : i32
    return %c0_i32, %c0_i32_0 : i32, i32
  }
  func.func @transform_3(%arg0: i32) -> (i32, i32) {
    %c0_i32 = arith.constant 0 : i32
    %c0_i32_0 = arith.constant 0 : i32
    %c0_i32_1 = arith.constant 0 : i32
    return %c0_i32, %c0_i32_0 : i32, i32
  }
  func.func @transform_4(%arg0: i32) -> (i32, i32) {
    %c0_i32 = arith.constant 0 : i32
    %c0_i32_0 = arith.constant 0 : i32
    %c0_i32_1 = arith.constant 0 : i32
    return %c0_i32, %c0_i32_0 : i32, i32
  }
  func.func @transform_5(%arg0: i32) -> (i32, i32) {
    %c0_i32 = arith.constant 0 : i32
    %c0_i32_0 = arith.constant 0 : i32
    %c0_i32_1 = arith.constant 0 : i32
    return %c0_i32, %c0_i32_0 : i32, i32
  }
}

</mosaic_0001>

<bundles_post_ra>
// kernel: fnn_forward.3
= control target key start
LH: loop header
LB: loop body
LE: loop exit
PB: predicated region body
PF: predicated region fallthrough
CT: control target
= control target key end

     0   :  { %s639_s30 = smov 0   ;;  %s824_s0 = inlined_call_operand.vmem [shape: f32[48,128], index: 0, kind: input, shape index: {}]   ;;  %s825_s1 = inlined_call_operand.vmem [shape: f32[128,128], index: 1, kind: input, shape index: {}]   ;;  %s826_s2 = inlined_call_operand.vmem [shape: f32[1,128], index: 2, kind: input, shape index: {}]   ;;  %s827_s3 = inlined_call_operand.vmem [shape: f32[1,128], index: 3, kind: input, shape index: {}]   ;;  %s828_s4 = inlined_call_operand.vmem [shape: f32[1,128], index: 4, kind: input, shape index: {}]   ;;  %s829_s5 = inlined_call_operand.vmem [shape: f32[128,128], index: 5, kind: input, shape index: {}]   ;;  %s830_s6 = inlined_call_operand.vmem [shape: f32[1,128], index: 6, kind: input, shape index: {}]   ;;  %s831_s7 = inlined_call_operand.vmem [shape: f32[128,128], index: 7, kind: input, shape index: {}]   ;;  %s832_s8 = inlined_call_operand.vmem [shape: f32[1,128], index: 8, kind: input, shape index: {}]   ;;  %s833_s9 = inlined_call_operand.vmem [shape: f32[48,128], index: 9, kind: output, shape index: {}]  }
   0x1 LB: > { %s541_s10 = sadd.s32 4294967295, %s587_s30   ;;  %p545_p0 = scmp.ge.s32.totalorder %s587_s30, 1  ;;  %s587_s30 = sphi %s639_s30, %s19_s30  }
   0x2   : > { %p288_p1 = scmp.lt.s32.totalorder %s587_s30, 4 }
   0x4   : > { %p289_p2 = pnand %p545_p0, %p288_p1 }
   0x5   : > { %s546_s18 = sshll.u32 (!%p289_p2), %s541_s10, 1 }
   0x6   : > { %292 = sbr.rel (%p289_p2) target bundleno = 450 (0x1c2), region = 56  ;;  %p325_p3 = scmp.lt.s32.totalorder (!%p289_p2), %s546_s18, 5 }
   0xb   : > { %v353_v0 = vld [vmem:[%s825_s1 + $0x78] sm:$0xff]  ;;  %v352_v1 = vld [vmem:[%s825_s1 + $0x70] sm:$0xff]  ;;  %v351_v2 = vld [vmem:[%s825_s1 + $0x68] sm:$0xff]  ;;  %s835_s18 = smov (!%p325_p3, %s546_s18), 5 }
   0xc   : > { %358 = vmatpush.msra.mxu0 %v353_v0  ;;  %552 = vmatpush.msra.mxu3 %v353_v0  ;;  %v350_v3 = vld [vmem:[%s825_s1 + $0x60] sm:$0xff]  ;;  %v410_v4 = vld [vmem:[%s829_s5 + $0x78] sm:$0xff]  ;;  %v409_v5 = vld [vmem:[%s829_s5 + $0x70] sm:$0xff]  ;;  %s547_s20 = sshll.u32 %s835_s18, 3 }
   0xd   : > { %v349_v6 = vld [vmem:[%s825_s1 + $0x58] sm:$0xff]  ;;  %415 = vmatpush.msra.mxu1 %v410_v4  ;;  %v408_v7 = vld [vmem:[%s829_s5 + $0x68] sm:$0xff]  ;;  %v348_v8 = vld [vmem:[%s825_s1 + $0x50] sm:$0xff]  ;;  %s328_s28 = scalar_lea.vmem %s824_s0, %s547_s20  ;;  %s334_s12 = scalar_lea.vmem %s833_s9, %s547_s20 }
   0xe   : > { %359 = vmatpush.msra.mxu0 %v352_v1  ;;  %553 = vmatpush.msra.mxu3 %v352_v1  ;;  %v407_v9 = vld [vmem:[%s829_s5 + $0x60] sm:$0xff]  ;;  %v347_v10 = vld [vmem:[%s825_s1 + $0x48] sm:$0xff]  ;;  %v406_v11 = vld [vmem:[%s829_s5 + $0x58] sm:$0xff] }
   0xf   : > { %416 = vmatpush.msra.mxu1 %v409_v5  ;;  %v346_v12 = vld [vmem:[%s825_s1 + $0x40] sm:$0xff]  ;;  %v405_v13 = vld [vmem:[%s829_s5 + $0x50] sm:$0xff]  ;;  %v345_v14 = vld [vmem:[%s825_s1 + $0x38] sm:$0xff] }
  0x10   : > { %360 = vmatpush.msra.mxu0 %v351_v2  ;;  %554 = vmatpush.msra.mxu3 %v351_v2  ;;  %v404_v15 = vld [vmem:[%s829_s5 + $0x48] sm:$0xff]  ;;  %v344_v16 = vld [vmem:[%s825_s1 + $0x30] sm:$0xff]  ;;  %v403_v17 = vld [vmem:[%s829_s5 + $0x40] sm:$0xff] }
  0x11   : > { %417 = vmatpush.msra.mxu1 %v408_v7  ;;  %v343_v18 = vld [vmem:[%s825_s1 + $0x28] sm:$0xff]  ;;  %v402_v19 = vld [vmem:[%s829_s5 + $0x38] sm:$0xff]  ;;  %v342_v20 = vld [vmem:[%s825_s1 + $0x20] sm:$0xff] }
  0x12   : > { %361 = vmatpush.msra.mxu0 %v350_v3  ;;  %555 = vmatpush.msra.mxu3 %v350_v3  ;;  %v401_v21 = vld [vmem:[%s829_s5 + $0x30] sm:$0xff]  ;;  %v341_v22 = vld [vmem:[%s825_s1 + $0x18] sm:$0xff]  ;;  %v400_v23 = vld [vmem:[%s829_s5 + $0x28] sm:$0xff] }
  0x13   : > { %418 = vmatpush.msra.mxu1 %v407_v9  ;;  %v340_v24 = vld [vmem:[%s825_s1 + $0x10] sm:$0xff]  ;;  %v339_v25 = vld [vmem:[%s825_s1 + $0x8] sm:$0xff]  ;;  %v338_v26 = vld [vmem:[%s825_s1] sm:$0xff] }
  0x14   : > { %362 = vmatpush.msra.mxu0 %v349_v6  ;;  %556 = vmatpush.msra.mxu3 %v349_v6  ;;  %v336_v27 = vld [vmem:[%s328_s28] sm:$0xff]  ;;  %v337_v28 = vld [vmem:[%s328_s28 + $0x8] sm:$0xff]  ;;  %v398_v30 = vld [vmem:[%s829_s5 + $0x18] sm:$0xff] }
  0x15   : > { %419 = vmatpush.msra.mxu1 %v406_v11  ;;  %v399_v29 = vld [vmem:[%s829_s5 + $0x20] sm:$0xff]  ;;  %v397_v31 = vld [vmem:[%s829_s5 + $0x10] sm:$0xff]  ;;  %v396_v32 = vld [vmem:[%s829_s5 + $0x8] sm:$0xff] }
  0x16   : > { %363 = vmatpush.msra.mxu0 %v348_v8  ;;  %557 = vmatpush.msra.mxu3 %v348_v8  ;;  %v395_v33 = vld [vmem:[%s829_s5] sm:$0xff]  ;;  %v455_v34 = vld [vmem:[%s831_s7 + $0x78] sm:$0xff]  ;;  %v454_v35 = vld [vmem:[%s831_s7 + $0x70] sm:$0xff] }
  0x17   : > { %420 = vmatpush.msra.mxu1 %v405_v13  ;;  %460 = vmatpush.msra.mxu2 %v455_v34  ;;  %v453_v36 = vld [vmem:[%s831_s7 + $0x68] sm:$0xff]  ;;  %v452_v37 = vld [vmem:[%s831_s7 + $0x60] sm:$0xff]  ;;  %v451_v38 = vld [vmem:[%s831_s7 + $0x58] sm:$0xff] }
  0x18   : > { %364 = vmatpush.msra.mxu0 %v347_v10  ;;  %558 = vmatpush.msra.mxu3 %v347_v10  ;;  %v450_v39 = vld [vmem:[%s831_s7 + $0x50] sm:$0xff]  ;;  %v449_v40 = vld [vmem:[%s831_s7 + $0x48] sm:$0xff]  ;;  %v576_v41 = vld [vmem:[%s826_s2] ss:$0 sm:$0xff] }
  0x19   : > { %421 = vmatpush.msra.mxu1 %v404_v15  ;;  %461 = vmatpush.msra.mxu2 %v454_v35  ;;  %v448_v42 = vld [vmem:[%s831_s7 + $0x40] sm:$0xff]  ;;  %v447_v44 = vld [vmem:[%s831_s7 + $0x38] sm:$0xff]  ;;  %v446_v48 = vld [vmem:[%s831_s7 + $0x30] sm:$0xff] }
  0x1a   : > { %365 = vmatpush.msra.mxu0 %v346_v12  ;;  %559 = vmatpush.msra.mxu3 %v346_v12  ;;  %v577_v43 = vld [vmem:[%s827_s3] ss:$0 sm:$0xff]  ;;  %v445_v50 = vld [vmem:[%s831_s7 + $0x28] sm:$0xff]  ;;  %v443_v56 = vld [vmem:[%s831_s7 + $0x18] sm:$0xff] }
  0x1b   : > { %422 = vmatpush.msra.mxu1 %v403_v17  ;;  %462 = vmatpush.msra.mxu2 %v453_v36  ;;  %v578_v47 = vld [vmem:[%s828_s4] ss:$0 sm:$0xff]  ;;  %v442_v60 = vld [vmem:[%s831_s7 + $0x10] sm:$0xff]  ;;  %v441_v61 = vld [vmem:[%s831_s7 + $0x8] sm:$0xff] }
  0x1c   : > { %366 = vmatpush.msra.mxu0 %v345_v14  ;;  %560 = vmatpush.msra.mxu3 %v345_v14  ;;  %v444_v52 = vld [vmem:[%s831_s7 + $0x20] sm:$0xff] }
  0x1d   : > { %423 = vmatpush.msra.mxu1 %v402_v19  ;;  %463 = vmatpush.msra.mxu2 %v452_v37  ;;  %v440_v62 = vld [vmem:[%s831_s7] sm:$0xff] }
  0x1e   : > { %367 = vmatpush.msra.mxu0 %v344_v16  ;;  %561 = vmatpush.msra.mxu3 %v344_v16  ;;  %v579_v63 = vld [vmem:[%s830_s6] ss:$0 sm:$0xff] }
  0x1f   : > { %424 = vmatpush.msra.mxu1 %v401_v21  ;;  %464 = vmatpush.msra.mxu2 %v451_v38  ;;  %v580_v6 = vld [vmem:[%s832_s8] ss:$0 sm:$0xff] }
  0x20   : > { %368 = vmatpush.msra.mxu0 %v343_v18  ;;  %562 = vmatpush.msra.mxu3 %v343_v18 }
  0x21   : > { %425 = vmatpush.msra.mxu1 %v400_v23  ;;  %465 = vmatpush.msra.mxu2 %v450_v39 }
  0x22   : > { %369 = vmatpush.msra.mxu0 %v342_v20  ;;  %563 = vmatpush.msra.mxu3 %v342_v20 }
  0x23   : > { %426 = vmatpush.msra.mxu1 %v399_v29  ;;  %466 = vmatpush.msra.mxu2 %v449_v40 }
  0x24   : > { %370 = vmatpush.msra.mxu0 %v341_v22  ;;  %564 = vmatpush.msra.mxu3 %v341_v22 }
  0x25   : > { %427 = vmatpush.msra.mxu1 %v398_v30  ;;  %467 = vmatpush.msra.mxu2 %v448_v42 }
  0x26   : > { %371 = vmatpush.msra.mxu0 %v340_v24  ;;  %565 = vmatpush.msra.mxu3 %v340_v24 }
  0x27   : > { %428 = vmatpush.msra.mxu1 %v397_v31  ;;  %468 = vmatpush.msra.mxu2 %v447_v44 }
  0x28   : > { %372 = vmatpush.msra.mxu0 %v339_v25  ;;  %566 = vmatpush.msra.mxu3 %v339_v25 }
  0x29   : > { %429 = vmatpush.msra.mxu1 %v396_v32  ;;  %469 = vmatpush.msra.mxu2 %v446_v48 }
  0x2a   : > { %373 = vmatpush.msra.mxu0 %v338_v26  ;;  %567 = vmatpush.msra.mxu3 %v338_v26 }
  0x2b   : > { %374 = vmatmul.f32.vlgmr.msra.gmra.mxu0 %v336_v27  ;;  %377 = vmatmul.f32.vlgmr.msra.gmra.mxu3 %v337_v28 }
  0x2c   : > { %430 = vmatpush.msra.mxu1 %v395_v33  ;;  %470 = vmatpush.msra.mxu2 %v445_v50 }
  0x2e   : > { %471 = vmatpush.msra.mxu2 %v444_v52 }
  0x30   : > { %472 = vmatpush.msra.mxu2 %v443_v56 }
  0x32   : > { %473 = vmatpush.msra.mxu2 %v442_v60 }
  0x34   : > { %474 = vmatpush.msra.mxu2 %v441_v61 }
  0x36   : > { %475 = vmatpush.msra.mxu2 %v440_v62 }
  0xa8   : > { %v375_v45 = vpop.f32.mrf.mxu0 }
  0xa9   : > { %v376_v46 = vadd.f32 %v576_v41, %v375_v45 }
  0xab   : > { %v385_v49 = vmul.f32 %v577_v43, %v376_v46 }
  0xad   : > { %v391_v51 = vadd.f32 %v578_v47, %v385_v49 }
  0xae   : > { %v378_v53 = vpop.f32.mrf.mxu3 }
  0xaf   : > { %v379_v54 = vadd.f32 %v576_v41, %v378_v53  ;;  %v393_v55 = vmax.f32 %v391_v51, 0.0 }
  0xb1   : > { %v386_v57 = vmul.f32 %v577_v43, %v379_v54  ;;  %431 = vmatmul.f32.vlgmr.msra.gmra.mxu1 %v393_v55 }
  0xb3   : > { %v392_v58 = vadd.f32 %v578_v47, %v386_v57 }
  0xb5   : > { %v394_v59 = vmax.f32 %v392_v58, 0.0 }
  0xb9   : > { %434 = vmatmul.f32.gmra.mxu1 %v394_v59 }
 0x12e   : > { %v432_v0 = vpop.f32.mrf.mxu1 }
 0x12f   : > { %v433_v1 = vadd.f32 %v579_v63, %v432_v0 }
 0x131   : > { %v438_v2 = vmax.f32 %v433_v1, 0.0 }
 0x133   : > { %476 = vmatmul.f32.vlgmr.msra.gmra.mxu2 %v438_v2 }
 0x136   : > { %v435_v3 = vpop.f32.mrf.mxu1 }
 0x137   : > { %v436_v4 = vadd.f32 %v579_v63, %v435_v3 }
 0x139   : > { %v439_v5 = vmax.f32 %v436_v4, 0.0 }
 0x13b   : > { %479 = vmatmul.f32.gmra.mxu2 %v439_v5 }
 0x1b6   : > { %v477_v7 = vpop.f32.mrf.mxu2 }
 0x1b7   : > { %v478_v8 = vadd.f32 %v580_v6, %v477_v7 }
 0x1b9   : > { %483 = vst [vmem:[%s334_s12] sm:$0xff] %v478_v8 }
 0x1be   : > { %v480_v9 = vpop.f32.mrf.mxu2 }
 0x1bf   : > { %v481_v10 = vadd.f32 %v580_v6, %v480_v9 }
 0x1c1   : > { %484 = vst [vmem:[%s334_s12 + $0x8] sm:$0xff] %v481_v10 }
 0x1c2 PF: > { %s19_s30 = sadd.s32 1, %s587_s30  }
 0x1c3   : > { %p16_p4 = scmp.ge.s32.totalorder %s19_s30, 5  }
 0x1c5   :  { %18 = sbr.rel (!%p16_p4) target bundleno = 1 (0x1), region = 86 }

// kernel: fnn_forward.2
= control target key start
LH: loop header
LB: loop body
LE: loop exit
PB: predicated region body
PF: predicated region fallthrough
CT: control target
= control target key end

     0   :  { %s444_s18 = smov 0   ;;  %s534_s0 = inlined_call_operand.vmem [shape: f32[48,128], index: 0, kind: input, shape index: {}]   ;;  %s535_s1 = inlined_call_operand.vmem [shape: f32[48,1], index: 1, kind: input, shape index: {}]   ;;  %s536_s2 = inlined_call_operand.vmem [shape: f32[128,128], index: 2, kind: input, shape index: {}]   ;;  %s537_s3 = inlined_call_operand.vmem [shape: f32[1,128], index: 3, kind: input, shape index: {}]   ;;  %s538_s4 = inlined_call_operand.vmem [shape: f32[1,128], index: 4, kind: output, shape index: {0}]   ;;  %s539_s5 = inlined_call_operand.vmem [shape: f32[1,128], index: 5, kind: output, shape index: {1}]  }
   0x1 LB: > { %s365_s19 = sadd.s32 4294967295, %s410_s18   ;;  %p368_p0 = scmp.ge.s32.totalorder %s410_s18, 1  ;;  %s410_s18 = sphi %s444_s18, %s16_s18  }
   0x2   : > { %p192_p1 = scmp.lt.s32.totalorder %s410_s18, 4 }
   0x4   : > { %p193_p2 = pnand %p368_p0, %p192_p1 }
   0x5   : > { %s369_s20 = sshll.u32 (!%p193_p2), %s365_s19, 1  ;;  %p373_p4 = scmp.ne.s32.totalorder (!%p193_p2), %s365_s19, 0 }
   0x6   : > { %196 = sbr.rel (%p193_p2) target bundleno = 200 (0xc8), region = 36  ;;  %p221_p3 = scmp.lt.s32.totalorder (!%p193_p2), %s369_s20, 5 }
   0xb   : > { %s541_s20 = smov (!%p221_p3, %s369_s20), 5  ;;  %235 = sbr.rel (%p373_p4) target bundleno = 19 (0x13), region = 40 }
   0xc   : > { %s370_s21 = sshll.u32 %s541_s20, 3 }
   0xd   : > { %s455_s24 = scalar_lea.vmem %s534_s0, %s370_s21  ;;  %s230_s27 = scalar_lea.vmem %s535_s1, %s370_s21 }
  0x10   : > { %v412_v0 = vmov 0.0  }
  0x11   : > { %236 = vst [vmem:[%s538_s4] sm:$0x1] %v412_v0 }
  0x12   : > { %237 = vst [vmem:[%s539_s5] sm:$0x1] %v412_v0 }
  0x13 PF: > { %v255_v1 = vld [vmem:[%s536_s2 + $0x78] sm:$0xff]  ;;  %v254_v2 = vld [vmem:[%s536_s2 + $0x70] sm:$0xff]  ;;  %v253_v3 = vld [vmem:[%s536_s2 + $0x68] sm:$0xff]  ;;  %v413_v4 = vmov 0  }
  0x14   : > { %260 = vmatpush.msra.mxu0 %v255_v1  ;;  %376 = vmatpush.msra.mxu1 %v255_v1  ;;  %v252_v5 = vld [vmem:[%s536_s2 + $0x60] sm:$0xff]  ;;  %v251_v7 = vld [vmem:[%s536_s2 + $0x58] sm:$0xff]  ;;  %v250_v8 = vld [vmem:[%s536_s2 + $0x50] sm:$0xff] }
  0x15   : > { %402 = vset.pattern.permute.xlu0 %v413_v4  ;;  %v283_v6 = vld [vmem:[%s230_s27] sm:$0xff]  ;;  %v249_v9 = vld [vmem:[%s536_s2 + $0x48] sm:$0xff]  ;;  %v247_v12 = vld [vmem:[%s536_s2 + $0x38] sm:$0xff] }
  0x16   : > { %261 = vmatpush.msra.mxu0 %v254_v2  ;;  %377 = vmatpush.msra.mxu1 %v254_v2  ;;  %v284_v10 = vld [vmem:[%s230_s27 + $0x8] sm:$0xff]  ;;  %v248_v11 = vld [vmem:[%s536_s2 + $0x40] sm:$0xff]  ;;  %v246_v13 = vld [vmem:[%s536_s2 + $0x30] sm:$0xff] }
  0x17   : > { %287 = vperm.xlu0 %402, %v283_v6   ;;  %v245_v14 = vld [vmem:[%s536_s2 + $0x28] sm:$0xff]  ;;  %v244_v15 = vld [vmem:[%s536_s2 + $0x20] sm:$0xff]  ;;  %v243_v16 = vld [vmem:[%s536_s2 + $0x18] sm:$0xff] }
  0x18   : > { %262 = vmatpush.msra.mxu0 %v253_v3  ;;  %378 = vmatpush.msra.mxu1 %v253_v3  ;;  %v242_v17 = vld [vmem:[%s536_s2 + $0x10] sm:$0xff]  ;;  %v241_v18 = vld [vmem:[%s536_s2 + $0x8] sm:$0xff]  ;;  %v240_v19 = vld [vmem:[%s536_s2] sm:$0xff] }
  0x19   : > { %v238_v20 = vld [vmem:[%s455_s24] sm:$0xff]  ;;  %v239_v21 = vld [vmem:[%s455_s24 + $0x8] sm:$0xff] }
  0x1a   : > { %263 = vmatpush.msra.mxu0 %v252_v5  ;;  %379 = vmatpush.msra.mxu1 %v252_v5  ;;  %v403_v23 = vld [vmem:[%s537_s3] ss:$0 sm:$0xff] }
  0x1b   : > { %v297_v44 = vld [vmem:[%s538_s4] sm:$0x1] }
  0x1c   : > { %264 = vmatpush.msra.mxu0 %v251_v7  ;;  %380 = vmatpush.msra.mxu1 %v251_v7  ;;  %v307_v47 = vld [vmem:[%s539_s5] sm:$0x1] }
  0x1e   : > { %265 = vmatpush.msra.mxu0 %v250_v8  ;;  %381 = vmatpush.msra.mxu1 %v250_v8 }
  0x1f   : > { %292 = vperm.xlu0 %402, %v284_v10  }
  0x20   : > { %266 = vmatpush.msra.mxu0 %v249_v9  ;;  %382 = vmatpush.msra.mxu1 %v249_v9 }
  0x22   : > { %267 = vmatpush.msra.mxu0 %v248_v11  ;;  %383 = vmatpush.msra.mxu1 %v248_v11 }
  0x24   : > { %268 = vmatpush.msra.mxu0 %v247_v12  ;;  %384 = vmatpush.msra.mxu1 %v247_v12 }
  0x26   : > { %269 = vmatpush.msra.mxu0 %v246_v13  ;;  %385 = vmatpush.msra.mxu1 %v246_v13 }
  0x28   : > { %270 = vmatpush.msra.mxu0 %v245_v14  ;;  %386 = vmatpush.msra.mxu1 %v245_v14 }
  0x2a   : > { %271 = vmatpush.msra.mxu0 %v244_v15  ;;  %387 = vmatpush.msra.mxu1 %v244_v15 }
  0x2c   : > { %272 = vmatpush.msra.mxu0 %v243_v16  ;;  %388 = vmatpush.msra.mxu1 %v243_v16 }
  0x2e   : > { %273 = vmatpush.msra.mxu0 %v242_v17  ;;  %389 = vmatpush.msra.mxu1 %v242_v17 }
  0x30   : > { %274 = vmatpush.msra.mxu0 %v241_v18  ;;  %390 = vmatpush.msra.mxu1 %v241_v18 }
  0x32   : > { %275 = vmatpush.msra.mxu0 %v240_v19  ;;  %391 = vmatpush.msra.mxu1 %v240_v19 }
  0x33   : > { %276 = vmatmul.f32.vlgmr.msra.gmra.mxu0 %v238_v20  ;;  %279 = vmatmul.f32.vlgmr.msra.gmra.mxu1 %v239_v21 }
  0x89   : > { %v288_v22 = vpop.permute.xlu0 %287 }
  0x91   : > { %v293_v28 = vpop.permute.xlu0 %292 }
  0xb0   : > { %v277_v24 = vpop.f32.mrf.mxu0  ;;  %v280_v25 = vpop.f32.mrf.mxu1 }
  0xb1   : > { %v278_v26 = vadd.f32 %v403_v23, %v277_v24  ;;  %v281_v27 = vadd.f32 %v403_v23, %v280_v25 }
  0xb3   : > { %v295_v29 = vmul.f32 %v288_v22, %v278_v26  ;;  %v296_v30 = vmul.f32 %v293_v28, %v281_v27 }
  0xb5   : > { %v308_v31 = vmul.f32 %v295_v29, %v295_v29  ;;  %v298_v32 = vadd.f32 %v296_v30, %v295_v29  ;;  %v309_v33 = vmul.f32 %v296_v30, %v296_v30 }
  0xb7   : > { %v299_v34 = vrot.slane %v298_v32, 4  ;;  %v310_v35 = vadd.f32 %v309_v33, %v308_v31 }
  0xb9   : > { %v300_v36 = vadd.f32 %v299_v34, %v298_v32  ;;  %v311_v37 = vrot.slane %v310_v35, 4 }
  0xbb   : > { %v301_v38 = vrot.slane %v300_v36, 2  ;;  %v312_v39 = vadd.f32 %v311_v37, %v310_v35 }
  0xbd   : > { %v302_v40 = vadd.f32 %v301_v38, %v300_v36  ;;  %v313_v41 = vrot.slane %v312_v39, 2 }
  0xbf   : > { %v303_v42 = vrot.slane %v302_v40, 1  ;;  %v314_v43 = vadd.f32 %v313_v41, %v312_v39 }
  0xc1   : > { %v304_v45 = vadd.f32 %v303_v42, %v302_v40  ;;  %v315_v46 = vrot.slane %v314_v43, 1 }
  0xc3   : > { %v305_v48 = vadd.f32 %v304_v45, %v297_v44  ;;  %v316_v49 = vadd.f32 %v315_v46, %v314_v43 }
  0xc5   : > { %306 = vst [vmem:[%s538_s4] sm:$0x1] %v305_v48  ;;  %v317_v50 = vadd.f32 %v316_v49, %v307_v47 }
  0xc7   : > { %318 = vst [vmem:[%s539_s5] sm:$0x1] %v317_v50 }
  0xc8 PF: > { %s16_s18 = sadd.s32 1, %s410_s18  }
  0xc9   : > { %p13_p5 = scmp.ge.s32.totalorder %s16_s18, 5  }
  0xcb   :  { %15 = sbr.rel (!%p13_p5) target bundleno = 1 (0x1), region = 77 }

</bundles_post_ra>
